<compile_context>
chip_gen: v5e
topology: v5e:2x2
jax: 0.10.0
libtpu: 0.0.40
codegen_flags: <defaults>
</compile_context>

<pallas_src>
import jax
import jax.numpy as jnp
from jax.experimental import pallas as pl
from jax.experimental.pallas import tpu as pltpu


def _round_up(x, m):
    return ((x + m - 1) // m) * m


def _link_pred_kernel(pid_ref, sid_ref,      # (1, 1, TB) int32 id tiles (VMEM)
                      sp_ref, ss_ref,        # (num_p, 1) / (num_s, 1) f32 scores (VMEM)
                      b_ref,                 # (1, 1) f32 bias (SMEM)
                      o_ref):                # (1, 1, TB) f32 output tile
    pids = pid_ref[0]                        # (1, TB) int32
    sids = sid_ref[0]                        # (1, TB) int32
    num_p = sp_ref.shape[0]
    num_s = ss_ref.shape[0]
    tb = o_ref.shape[-1]

    # Vectorized one-hot gather of the folded per-table scores:
    #   mask[r, l] = (r == id[l]);  gathered[l] = sum_r mask[r, l] * score[r]
    # Exactly one row is selected per lane, so the sum is a bit-exact gather.
    rows_p = jax.lax.broadcasted_iota(jnp.int32, (num_p, tb), 0)
    rows_s = jax.lax.broadcasted_iota(jnp.int32, (num_s, tb), 0)

    sel_p = jnp.where(rows_p == pids, sp_ref[...], 0.0)     # (num_p, TB)
    sel_s = jnp.where(rows_s == sids, ss_ref[...], 0.0)     # (num_s, TB)

    logit = (jnp.sum(sel_p, axis=0, keepdims=True)
             + jnp.sum(sel_s, axis=0, keepdims=True)
             + b_ref[0, 0])                                  # (1, TB)

    o_ref[0] = jax.nn.sigmoid(logit).astype(o_ref.dtype)


def graphsage_link_prediction(playlist_ids, song_ids, params, *,
                              block_batch=256):
    """Forward pass. Returns (B, 1) float32 predictions in [0, 1]."""
    p_table = params["playlist_embedding"]   # (num_playlists, Dp)
    s_table = params["song_embedding"]       # (num_songs, Ds)
    w = params["fc_weight"]                  # (Dp + Ds, 1)
    b = params["fc_bias"]                    # (1, 1)

    num_p, dp = p_table.shape
    num_s, ds = s_table.shape
    B = playlist_ids.shape[0]

    assert block_batch % 128 == 0
    tb = min(block_batch, _round_up(B, 128))   # lane-dense batch tile
    b_pad = _round_up(B, tb)
    n_tiles = b_pad // tb

    # Algebraic fold of the 1-output Linear (dropout is identity in eval):
    # per-table score vectors, computed once by XLA over the (HBM) tables.
    score_p = p_table.astype(jnp.float32) @ w[:dp].astype(jnp.float32)  # (num_p, 1)
    score_s = s_table.astype(jnp.float32) @ w[dp:].astype(jnp.float32)  # (num_s, 1)
    bias = jnp.asarray(b, jnp.float32).reshape(1, 1)

    # Clamp ids (PyTorch raises on OOB; here clamp so the one-hot select stays
    # well-defined) and pad the batch to the tile boundary with id 0.
    pids = jnp.clip(playlist_ids.astype(jnp.int32), 0, num_p - 1)
    sids = jnp.clip(song_ids.astype(jnp.int32), 0, num_s - 1)
    pids = jnp.pad(pids, (0, b_pad - B)).reshape(n_tiles, 1, tb)
    sids = jnp.pad(sids, (0, b_pad - B)).reshape(n_tiles, 1, tb)

    out = pl.pallas_call(
        _link_pred_kernel,
        out_shape=jax.ShapeDtypeStruct((n_tiles, 1, tb), jnp.float32),
        grid=(n_tiles,),
        in_specs=[
            pl.BlockSpec((1, 1, tb), lambda i: (i, 0, 0)),     # playlist id tile
            pl.BlockSpec((1, 1, tb), lambda i: (i, 0, 0)),     # song id tile
            pl.BlockSpec((num_p, 1), lambda i: (0, 0)),        # resident score_p
            pl.BlockSpec((num_s, 1), lambda i: (0, 0)),        # resident score_s
            pl.BlockSpec(memory_space=pltpu.MemorySpace.SMEM),  # bias scalar
        ],
        out_specs=pl.BlockSpec((1, 1, tb), lambda i: (i, 0, 0)),
        compiler_params=pltpu.CompilerParams(
            dimension_semantics=("parallel",),
            vmem_limit_bytes=32 * 1024 * 1024,
        ),
    )(pids, sids, score_p, score_s, bias)

    # Lane-dense (n_tiles, 1, TB) -> (B, 1); padded tail rows are sliced off.
    return out.reshape(b_pad, 1)[:B]


def init_params(key, num_playlists, num_songs, playlist_dim, song_dim):
    k1, k2, k3, k4 = jax.random.split(key, 4)
    d = playlist_dim + song_dim
    bound = 1.0 / jnp.sqrt(d)  # nn.Linear default init range
    return {
        # nn.Embedding default init: N(0, 1)
        "playlist_embedding": jax.random.normal(
            k1, (num_playlists, playlist_dim), jnp.float32),
        "song_embedding": jax.random.normal(
            k2, (num_songs, song_dim), jnp.float32),
        # nn.Linear default init: U(-1/sqrt(fan_in), 1/sqrt(fan_in))
        "fc_weight": jax.random.uniform(
            k3, (d, 1), jnp.float32, minval=-bound, maxval=bound),
        "fc_bias": jax.random.uniform(
            k4, (1, 1), jnp.float32, minval=-bound, maxval=bound),
    }


if __name__ == "__main__":
    key = jax.random.PRNGKey(0)
    num_playlists, num_songs = 64, 128
    playlist_dim, song_dim = 32, 32
    batch = 200                      # non-multiple of the tile -> exercises padding

    kp, ki1, ki2 = jax.random.split(key, 3)
    params = init_params(kp, num_playlists, num_songs, playlist_dim, song_dim)

    playlist_ids = jax.random.randint(ki1, (batch,), 0, num_playlists, jnp.int32)
    song_ids = jax.random.randint(ki2, (batch,), 0, num_songs, jnp.int32)

    # block_batch=128 -> tb=128, b_pad=256, n_tiles=2 (even: v7x 2-TC friendly).
    preds = graphsage_link_prediction(playlist_ids, song_ids, params,
                                      block_batch=128)
    jax.block_until_ready(preds)

    # Pure-JAX reference check (same math as the PyTorch module, no Pallas).
    p_emb = jnp.take(params["playlist_embedding"], playlist_ids, axis=0)
    s_emb = jnp.take(params["song_embedding"], song_ids, axis=0)
    x = jnp.concatenate([p_emb, s_emb], axis=1)
    ref = jax.nn.sigmoid(x @ params["fc_weight"] + params["fc_bias"][0, 0])

    assert preds.shape == (batch, 1)
    assert jnp.allclose(preds, ref, atol=1e-5), "mismatch vs reference"

    print("KERNEL_OK")
</pallas_src>

<mosaic_0001>
module attributes {stable_mosaic.version = 11 : i64} {
  func.func @_link_pred_kernel(%arg0: i32, %arg1: memref<1x1x128xi32, #tpu.memory_space<vmem>>, %arg2: memref<1x1x128xi32, #tpu.memory_space<vmem>>, %arg3: memref<64x1xf32, #tpu.memory_space<vmem>>, %arg4: memref<128x1xf32, #tpu.memory_space<vmem>>, %arg5: memref<1x1xf32, #tpu.memory_space<smem>>, %arg6: memref<1x1x128xf32, #tpu.memory_space<vmem>>) attributes {dimension_semantics = [#tpu.dimension_semantics<parallel>], iteration_bounds = array<i64: 2>, scalar_prefetch = 0 : i64, scratch_operands = 0 : i64, tpu.core_type = #tpu.core_type<tc>, window_params = [{transform_indices = @transform_0, window_bounds = array<i64: 1, 1, 128>}, {transform_indices = @transform_1, window_bounds = array<i64: 1, 1, 128>}, {pipeline_mode = #tpu.pipeline_mode<synchronous>, transform_indices = @transform_2, window_bounds = array<i64: 64, 1>}, {pipeline_mode = #tpu.pipeline_mode<synchronous>, transform_indices = @transform_3, window_bounds = array<i64: 128, 1>}, {transform_indices = @transform_4, window_bounds = array<i64: 1, 1>}, {transform_indices = @transform_5, window_bounds = array<i64: 1, 1, 128>}]} {
    %c0 = arith.constant 0 : index
    %c0_0 = arith.constant 0 : index
    %c0_1 = arith.constant 0 : index
    %0 = vector.load %arg1[%c0, %c0_0, %c0_1] : memref<1x1x128xi32, #tpu.memory_space<vmem>>, vector<1x1x128xi32>
    %1 = vector.shape_cast %0 : vector<1x1x128xi32> to vector<1x128xi32>
    %c0_2 = arith.constant 0 : index
    %c0_3 = arith.constant 0 : index
    %c0_4 = arith.constant 0 : index
    %2 = vector.load %arg2[%c0_2, %c0_3, %c0_4] : memref<1x1x128xi32, #tpu.memory_space<vmem>>, vector<1x1x128xi32>
    %3 = vector.shape_cast %2 : vector<1x1x128xi32> to vector<1x128xi32>
    %4 = tpu.iota {dimensions = array<i32: 0>} : vector<64x128xi32>
    %5 = tpu.iota {dimensions = array<i32: 0>} : vector<128x128xi32>
    %6 = vector.broadcast %1 : vector<1x128xi32> to vector<64x128xi32>
    %7 = arith.cmpi eq, %4, %6 : vector<64x128xi32>
    %c0_5 = arith.constant 0 : index
    %c0_6 = arith.constant 0 : index
    %8 = vector.load %arg3[%c0_5, %c0_6] : memref<64x1xf32, #tpu.memory_space<vmem>>, vector<64x1xf32>
    %cst = arith.constant 0.000000e+00 : f32
    %9 = vector.shape_cast %8 : vector<64x1xf32> to vector<64x1xf32>
    %10 = vector.broadcast %9 : vector<64x1xf32> to vector<64x128xf32>
    %11 = vector.broadcast %cst : f32 to vector<64x128xf32>
    %12 = arith.select %7, %10, %11 : vector<64x128xi1>, vector<64x128xf32>
    %13 = vector.broadcast %3 : vector<1x128xi32> to vector<128x128xi32>
    %14 = arith.cmpi eq, %5, %13 : vector<128x128xi32>
    %c0_7 = arith.constant 0 : index
    %c0_8 = arith.constant 0 : index
    %15 = vector.load %arg4[%c0_7, %c0_8] : memref<128x1xf32, #tpu.memory_space<vmem>>, vector<128x1xf32>
    %cst_9 = arith.constant 0.000000e+00 : f32
    %16 = vector.shape_cast %15 : vector<128x1xf32> to vector<128x1xf32>
    %17 = vector.broadcast %16 : vector<128x1xf32> to vector<128x128xf32>
    %18 = vector.broadcast %cst_9 : f32 to vector<128x128xf32>
    %19 = arith.select %14, %17, %18 : vector<128x128xi1>, vector<128x128xf32>
    %cst_10 = arith.constant dense<0.000000e+00> : vector<128xf32>
    %20 = vector.multi_reduction <add>, %12, %cst_10 [0] : vector<64x128xf32> to vector<128xf32>
    %21 = vector.shape_cast %20 : vector<128xf32> to vector<1x128xf32>
    %cst_11 = arith.constant dense<0.000000e+00> : vector<128xf32>
    %22 = vector.multi_reduction <add>, %19, %cst_11 [0] : vector<128x128xf32> to vector<128xf32>
    %23 = vector.shape_cast %22 : vector<128xf32> to vector<1x128xf32>
    %24 = arith.addf %21, %23 : vector<1x128xf32>
    %c0_12 = arith.constant 0 : index
    %c0_13 = arith.constant 0 : index
    %25 = memref.load %arg5[%c0_12, %c0_13] : memref<1x1xf32, #tpu.memory_space<smem>>
    %26 = vector.broadcast %25 : f32 to vector<1x128xf32>
    %27 = arith.addf %24, %26 : vector<1x128xf32>
    %28 = arith.negf %27 : vector<1x128xf32>
    %29 = math.exp %28 : vector<1x128xf32>
    %cst_14 = arith.constant 1.000000e+00 : f32
    %30 = vector.broadcast %cst_14 : f32 to vector<1x128xf32>
    %31 = arith.addf %30, %29 : vector<1x128xf32>
    %32 = arith.divf %30, %31 : vector<1x128xf32>
    %c0_15 = arith.constant 0 : index
    %c0_16 = arith.constant 0 : index
    %c0_17 = arith.constant 0 : index
    %33 = vector.load %arg6[%c0_15, %c0_16, %c0_17] : memref<1x1x128xf32, #tpu.memory_space<vmem>>, vector<1x1x128xf32>
    %34 = vector.shape_cast %33 : vector<1x1x128xf32> to vector<1x128xf32>
    %35 = vector.shape_cast %32 : vector<1x128xf32> to vector<1x1x128xf32>
    tpu.vector_store %arg6[%c0_15, %c0_16, %c0_17], %35 {strides = array<i32>} : memref<1x1x128xf32, #tpu.memory_space<vmem>>, vector<1x1x128xf32>,
    return
  }
  func.func @transform_0(%arg0: i32) -> (i32, i32, i32) {
    %c0_i32 = arith.constant 0 : i32
    %c0_i32_0 = arith.constant 0 : i32
    %c0_i32_1 = arith.constant 0 : i32
    return %arg0, %c0_i32, %c0_i32_0 : i32, i32, i32
  }
  func.func @transform_1(%arg0: i32) -> (i32, i32, i32) {
    %c0_i32 = arith.constant 0 : i32
    %c0_i32_0 = arith.constant 0 : i32
    %c0_i32_1 = arith.constant 0 : i32
    return %arg0, %c0_i32, %c0_i32_0 : i32, i32, i32
  }
  func.func @transform_2(%arg0: i32) -> (i32, i32) {
    %c0_i32 = arith.constant 0 : i32
    %c0_i32_0 = arith.constant 0 : i32
    %c0_i32_1 = arith.constant 0 : i32
    return %c0_i32, %c0_i32_0 : i32, i32
  }
  func.func @transform_3(%arg0: i32) -> (i32, i32) {
    %c0_i32 = arith.constant 0 : i32
    %c0_i32_0 = arith.constant 0 : i32
    %c0_i32_1 = arith.constant 0 : i32
    return %c0_i32, %c0_i32_0 : i32, i32
  }
  func.func @transform_4(%arg0: i32) -> (i32, i32) {
    %c0_i32 = arith.constant 0 : i32
    %c0_i32_0 = arith.constant 0 : i32
    %c0_i32_1 = arith.constant 0 : i32
    return %c0_i32, %c0_i32_0 : i32, i32
  }
  func.func @transform_5(%arg0: i32) -> (i32, i32, i32) {
    %c0_i32 = arith.constant 0 : i32
    %c0_i32_0 = arith.constant 0 : i32
    %c0_i32_1 = arith.constant 0 : i32
    return %arg0, %c0_i32, %c0_i32_0 : i32, i32, i32
  }
}

</mosaic_0001>

<bundles_post_ra>
// kernel: tpu_custom_call.1
= control target key start
LH: loop header
LB: loop body
LE: loop exit
PB: predicated region body
PF: predicated region fallthrough
CT: control target
= control target key end

     0   :  { %s968_s0 = inlined_call_operand.vmem [shape: s32[2,1,128], index: 0, kind: input, shape index: {}]   ;;  %s969_s1 = inlined_call_operand.vmem [shape: s32[2,1,128], index: 1, kind: input, shape index: {}]   ;;  %s970_s2 = inlined_call_operand.vmem [shape: f32[64,1], index: 2, kind: input, shape index: {}]   ;;  %s971_s3 = inlined_call_operand.vmem [shape: f32[128,1], index: 3, kind: input, shape index: {}]   ;;  %s972_s4 = inlined_call_operand.<no memory space> [shape: f32[1,1], index: 4, kind: input, shape index: {}]   ;;  %s973_s5 = inlined_call_operand.hbm [shape: f32[2,1,128], index: 5, kind: output, shape index: {}]  }
   0x1   :  { %10 = sst [smem:[#allocation2]] %s972_s4 }
   0x2   :  { %11 = vsyncpa [#allocation4], 0 }
   0x3   :  { %13 = vsyncpa [#allocation4 + $0x1], 0  ;;  %s730_s20 = smov 0   ;;  %s732_s21 = smov 0  }
   0x4   :  { %s734_s22 = smov 0   ;;  %s736_s23 = smov 0  }
   0x5 LB: > { %s751_s4 = sadd.s32 4294967295, %s694_s23   ;;  %s576_s24 = sadd.s32 4294967294, %s694_s23   ;;  %s694_s23 = sphi %s736_s23, %s979_s23   ;;  %s690_s22 = sphi %s734_s22, %s978_s22   ;;  %s686_s21 = sphi %s732_s21, %s977_s21   ;;  %s682_s20 = sphi %s730_s20, %s976_s20  }
   0x6   : > { %s755_s25 = sadd.s32 1, %s694_s23   ;;  %s141_s26 = sadd.s32 1, %s690_s22 }
   0x7   : > { %s138_s27 = ssub.s32 %s694_s23, %s755_s25  ;;  %p151_p0 = scmp.ne.s32.totalorder %s690_s22, %s686_s21 }
   0x8   : > { %p139_p1 = scmp.eq.s32.totalorder %s138_s27, 0  ;;  %p152_p2 = scmp.eq.s32.totalorder %s751_s4, 1 }
   0x9   : > { %p157_p3 = scmp.ne.s32.totalorder %s686_s21, %s682_s20  ;;  %p158_p4 = scmp.eq.s32.totalorder %s576_s24, 1 }
   0xa   : > { %s766_s28 = scalar_select %p139_p1, %s690_s22, %s141_s26  }
   0xb   : > { %p768_p5 = por %p152_p2, %p151_p0  ;;  %p772_p6 = por %p158_p4, %p157_p3 }
   0xc   : > { %p579_p7 = scmp.ge.s32.totalorder %s694_s23, 1  ;;  %p197_p8 = scmp.lt.s32.totalorder %s694_s23, 3 }
   0xe   : > { %p198_p9 = pnand %p579_p7, %p197_p8 }
   0xf   : > { %p225_p10 = scmp.lt.s32.totalorder (!%p198_p9), %s751_s4, 1  ;;  %s511_s7 = scalar_lea.hbm (!%p198_p9), %s973_s5, %s751_s4 }
  0x10   : > { %201 = sbr.rel (%p198_p9) target bundleno = 247 (0xf7), region = 40  ;;  %s515_s10 = sshll.u32 (!%p198_p9), %s511_s7, 4  ;;  %s516_s10 = int_to_ptr.hbm [resolvable:$true] %s515_s10 }
  0x11   : > { %s652_s17 = scalar_lea.hbm (!%p198_p9), %s973_s5, 2 }
  0x15   : > { %v263_v0 = vld [vmem:[%s970_s2 + $0x20] sm:$0xff]  ;;  %v261_v1 = vld [vmem:[%s970_s2 + $0x10] sm:$0xff]  ;;  %v696_v3 = vmov 0   ;;  %s789_s12 = scalar_select %p225_p10, %s751_s4, 1  ;;  %v262_v5 = vld [vmem:[%s970_s2 + $0x18] sm:$0xff]  ;;  %v233_v30 = vlaneseq }
  0x16   : > { %v259_v2 = vld [vmem:[%s970_s2] sm:$0xff]  ;;  %625 = vset.pattern.permute.xlu2 %v696_v3  ;;  %624 = vset.pattern.permute.xlu1 %v696_v3  ;;  %v260_v6 = vld [vmem:[%s970_s2 + $0x8] sm:$0xff]  ;;  %v335_v7 = vld [vmem:[%s971_s3 + $0x18] sm:$0xff]  ;;  %s646_s4 = sshra.s32 %s516_s10, 4  ;;  %s647_s4 = int_to_ptr.hbm [resolvable:$true] %s646_s4 }
  0x17   : > { %623 = vset.pattern.permute.xlu0 %v696_v3  ;;  %289 = vperm.xlu2 %625, %v263_v0   ;;  %s227_s15 = scalar_lea.vmem %s968_s0, %s789_s12  ;;  %s230_s18 = scalar_lea.vmem %s969_s1, %s789_s12  ;;  %v332_v4 = vld [vmem:[%s971_s3] sm:$0xff]  ;;  %v334_v8 = vld [vmem:[%s971_s3 + $0x10] sm:$0xff]  ;;  %v333_v9 = vld [vmem:[%s971_s3 + $0x8] sm:$0xff]  ;;  %v868_v33 = vshrl.u32 %v233_v30, 7 }
  0x18   : > { %279 = vperm.xlu1 %624, %v261_v1   ;;  %269 = vperm.xlu0 %623, %v259_v2   ;;  %v338_v10 = vld [vmem:[%s971_s3 + $0x30] sm:$0xff]  ;;  %v337_v11 = vld [vmem:[%s971_s3 + $0x28] sm:$0xff]  ;;  %v336_v12 = vld [vmem:[%s971_s3 + $0x20] sm:$0xff]  ;;  %s479_s12 = sld [smem:[#allocation2]]  ;;  %s648_s13 = scalar_lea.hbm %s647_s4, 1 }
  0x19   : > { %v341_v13 = vld [vmem:[%s971_s3 + $0x48] sm:$0xff]  ;;  %v340_v14 = vld [vmem:[%s971_s3 + $0x40] sm:$0xff]  ;;  %v339_v15 = vld [vmem:[%s971_s3 + $0x38] sm:$0xff]  ;;  %v235_v35 = vadd.s32 8, %v868_v33  ;;  %v236_v36 = vadd.s32 16, %v868_v33  ;;  %v237_v38 = vadd.s32 24, %v868_v33  ;;  %p649_p11 = scmp.ne.s32.totalorder %s647_s4, %s648_s13  ;;  %p653_p0 = scmp.lt.s32.totalorder %s647_s4, %s973_s5 }
  0x1a   : > { %v344_v16 = vld [vmem:[%s971_s3 + $0x60] sm:$0xff]  ;;  %v343_v17 = vld [vmem:[%s971_s3 + $0x58] sm:$0xff]  ;;  %v342_v18 = vld [vmem:[%s971_s3 + $0x50] sm:$0xff]  ;;  %v238_v45 = vadd.s32 32, %v868_v33  ;;  %v239_v47 = vadd.s32 40, %v868_v33  ;;  %v889_v54 = vadd.s32 48, %v868_v33  ;;  %p654_p1 = scmp.lt.s32.totalorder %s652_s17, %s648_s13 }
  0x1b   : > { %v265_v19 = vld [vmem:[%s970_s2 + $0x30] sm:$0xff]  ;;  %v345_v20 = vld [vmem:[%s971_s3 + $0x68] sm:$0xff]  ;;  %v347_v22 = vld [vmem:[%s971_s3 + $0x78] sm:$0xff]  ;;  %v893_v56 = vadd.s32 56, %v868_v33  ;;  %v242_v61 = vadd.s32 64, %v868_v33  ;;  %p650_p12 = pnand %p649_p11, %p768_p5 }
  0x1c   : > { %v264_v21 = vld [vmem:[%s970_s2 + $0x28] sm:$0xff]  ;;  %v266_v23 = vld [vmem:[%s970_s2 + $0x38] sm:$0xff]  ;;  %v346_v24 = vld [vmem:[%s971_s3 + $0x70] sm:$0xff]  ;;  %p655_p2 = por %p654_p1, %p653_p0 }
  0x1d   : > { %v875_v34 = vld [vmem:[%s230_s18] ss:$0 sm:$0xff]  ;;  %p651_p13 = pneg %p650_p12 }
  0x1e   : > { %vm316_vm0 = vcmp.eq.s32.totalorder %v868_v33, %v875_v34  ;;  %vm317_vm1 = vcmp.eq.s32.totalorder %v235_v35, %v875_v34  ;;  %vm318_vm2 = vcmp.eq.s32.totalorder %v236_v36, %v875_v34  ;;  %vm319_vm3 = vcmp.eq.s32.totalorder %v237_v38, %v875_v34  ;;  %v900_v58 = vld [vmem:[%s227_s15] ss:$0 sm:$0xff]  ;;  %s223_s15 = sand.u32 1, %s686_s21  }
  0x1f   : > { %350 = vperm.xlu2 %625, %v332_v4   ;;  %vm320_vm4 = vcmp.eq.s32.totalorder %v238_v45, %v875_v34  ;;  %vm321_vm5 = vcmp.eq.s32.totalorder %v239_v47, %v875_v34  ;;  %vm322_vm6 = vcmp.eq.s32.totalorder %v889_v54, %v875_v34  ;;  %vm323_vm7 = vcmp.eq.s32.totalorder %v893_v56, %v875_v34  ;;  %s224_s8 = scalar_lea.vmem [#allocation3], %s223_s15  ;;  %s503_s11 = scalar_lea.sflag [#allocation4], %s223_s15 }
  0x20   : > { %284 = vperm.xlu1 %624, %v262_v5   ;;  %274 = vperm.xlu0 %623, %v260_v6   ;;  %vm252_vm8 = vcmp.eq.s32.totalorder %v235_v35, %v900_v58  ;;  %vm251_vm9 = vcmp.eq.s32.totalorder %v868_v33, %v900_v58  ;;  %v243_v4 = vadd.s32 72, %v868_v33  ;;  %vm324_vm10 = vcmp.eq.s32.totalorder %v242_v61, %v875_v34  ;;  %s513_s9 = sshll.u32 %s224_s8, 4  ;;  %p656_p3 = pnand %p655_p2, %p651_p13  ;;  %s514_s9 = int_to_ptr.vmem [resolvable:$true] %s513_s9 }
  0x21   : > { %v244_v6 = vadd.s32 80, %v868_v33  ;;  %vm253_vm11 = vcmp.eq.s32.totalorder %v236_v36, %v900_v58  ;;  %vm254_vm14 = vcmp.eq.s32.totalorder %v237_v38, %v900_v58  ;;  %vm255_vm15 = vcmp.eq.s32.totalorder %v238_v45, %v900_v58 }
  0x22   : > { %vm325_vm12 = vcmp.eq.s32.totalorder %v243_v4, %v875_v34  ;;  %v248_v35 = vadd.s32 112, %v868_v33  ;;  %v249_v36 = vadd.s32 120, %v868_v33 }
  0x23   : > { %vm326_vm13 = vcmp.eq.s32.totalorder %v244_v6, %v875_v34 }
  0x27   : > { %365 = vperm.xlu2 %625, %v335_v7  }
  0x28   : > { %360 = vperm.xlu1 %624, %v334_v8   ;;  %355 = vperm.xlu0 %623, %v333_v9  }
  0x2f   : > { %380 = vperm.xlu2 %625, %v338_v10  }
  0x30   : > { %375 = vperm.xlu1 %624, %v337_v11   ;;  %370 = vperm.xlu0 %623, %v336_v12  }
  0x37   : > { %395 = vperm.xlu2 %625, %v341_v13  }
  0x38   : > { %390 = vperm.xlu1 %624, %v340_v14   ;;  %385 = vperm.xlu0 %623, %v339_v15   ;;  %v245_v14 = vadd.s32 88, %v868_v33 }
  0x3f   : > { %410 = vperm.xlu2 %625, %v344_v16  }
  0x40   : > { %405 = vperm.xlu1 %624, %v343_v17   ;;  %400 = vperm.xlu0 %623, %v342_v18  }
  0x47   : > { %299 = vperm.xlu2 %625, %v265_v19  }
  0x48   : > { %415 = vperm.xlu1 %624, %v345_v20   ;;  %294 = vperm.xlu0 %623, %v264_v21   ;;  %v246_v20 = vadd.s32 96, %v868_v33 }
  0x4f   : > { %425 = vperm.xlu2 %625, %v347_v22  }
  0x50   : > { %304 = vperm.xlu1 %624, %v266_v23   ;;  %420 = vperm.xlu0 %623, %v346_v24   ;;  %v247_v23 = vadd.s32 104, %v868_v33 }
  0x71   : > { %v862_v25 = vpop.permute.xlu2 %289 }
  0x79   : > { %v351_v26 = vpop.permute.xlu2 %350 }
  0x7a   : > { %v428_v41 = vsel %vm316_vm0, %v351_v26, 0.0  ;;  %vm327_vm0 = vcmp.eq.s32.totalorder %v245_v14, %v875_v34 }
  0x81   : > { %v366_v29 = vpop.permute.xlu2 %365 }
  0x82   : > { %v431_v48 = vsel %vm319_vm3, %v366_v29, 0.0  ;;  %vm329_vm3 = vcmp.eq.s32.totalorder %v247_v23, %v875_v34 }
  0x89   : > { %v381_v37 = vpop.permute.xlu2 %380 }
  0x8a   : > { %v864_v27 = vpop.permute.xlu1 %279  ;;  %v270_v28 = vpop.permute.xlu0 %269  ;;  %v434_v63 = vsel %vm322_vm6, %v381_v37, 0.0  ;;  %vm330_vm6 = vcmp.eq.s32.totalorder %v248_v35, %v875_v34 }
  0x8b   : > { %v307_v7 = vsel %vm251_vm9, %v270_v28, 0.0  ;;  %v309_v13 = vsel %vm253_vm11, %v864_v27, 0.0  ;;  %v311_v28 = vsel %vm255_vm15, %v862_v25, 0.0 }
  0x91   : > { %v396_v52 = vpop.permute.xlu2 %395 }
  0x92   : > { %v866_v31 = vpop.permute.xlu1 %284  ;;  %v275_v32 = vpop.permute.xlu0 %274  ;;  %v437_v16 = vsel %vm325_vm12, %v396_v52, 0.0 }
  0x93   : > { %v308_v2 = vsel %vm252_vm8, %v275_v32, 0.0  ;;  %v310_v19 = vsel %vm254_vm14, %v866_v31, 0.0 }
  0x94   : > { %v444_v8 = vadd.f32 %v308_v2, %v307_v7 }
  0x96   : > { %v445_v15 = vadd.f32 %v444_v8, %v309_v13 }
  0x98   : > { %v446_v24 = vadd.f32 %v445_v15, %v310_v19 }
  0x99   : > { %v411_v3 = vpop.permute.xlu2 %410 }
  0x9a   : > { %v361_v39 = vpop.permute.xlu1 %360  ;;  %v356_v40 = vpop.permute.xlu0 %355  ;;  %v447_v32 = vadd.f32 %v446_v24, %v311_v28 }
  0x9b   : > { %v429_v42 = vsel %vm317_vm1, %v356_v40, 0.0  ;;  %v430_v44 = vsel %vm318_vm2, %v361_v39, 0.0  ;;  %vm256_vm1 = vcmp.eq.s32.totalorder %v239_v47, %v900_v58  ;;  %vm328_vm2 = vcmp.eq.s32.totalorder %v246_v20, %v875_v34 }
  0x9c   : > { %v457_v43 = vadd.f32 %v429_v42, %v428_v41  ;;  %v440_v38 = vsel %vm328_vm2, %v411_v3, 0.0 }
  0x9e   : > { %v458_v46 = vadd.f32 %v457_v43, %v430_v44 }
  0xa0   : > { %v459_v51 = vadd.f32 %v458_v46, %v431_v48 }
  0xa1   : > { %v300_v21 = vpop.permute.xlu2 %299 }
  0xa2   : > { %v376_v49 = vpop.permute.xlu1 %375  ;;  %v371_v50 = vpop.permute.xlu0 %370 }
  0xa3   : > { %v432_v53 = vsel %vm320_vm4, %v371_v50, 0.0  ;;  %v433_v57 = vsel %vm321_vm5, %v376_v49, 0.0  ;;  %vm257_vm4 = vcmp.eq.s32.totalorder %v889_v54, %v900_v58  ;;  %vm258_vm5 = vcmp.eq.s32.totalorder %v893_v56, %v900_v58 }
  0xa4   : > { %v460_v55 = vadd.f32 %v459_v51, %v432_v53  ;;  %v313_v25 = vsel %vm257_vm4, %v300_v21, 0.0 }
  0xa6   : > { %v461_v59 = vadd.f32 %v460_v55, %v433_v57 }
  0xa8   : > { %v462_v1 = vadd.f32 %v461_v59, %v434_v63 }
  0xa9   : > { %v426_v41 = vpop.permute.xlu2 %425 }
  0xaa   : > { %v391_v60 = vpop.permute.xlu1 %390  ;;  %v386_v62 = vpop.permute.xlu0 %385 }
  0xab   : > { %v435_v0 = vsel %vm323_vm7, %v386_v62, 0.0  ;;  %v436_v9 = vsel %vm324_vm10, %v391_v60, 0.0  ;;  %vm331_vm7 = vcmp.eq.s32.totalorder %v249_v36, %v875_v34  ;;  %v480_v62 = vstv %s479_s12 }
  0xac   : > { %v463_v5 = vadd.f32 %v462_v1, %v435_v0  ;;  %v443_v49 = vsel %vm331_vm7, %v426_v41, 0.0 }
  0xae   : > { %v464_v10 = vadd.f32 %v463_v5, %v436_v9 }
  0xb0   : > { %v465_v18 = vadd.f32 %v464_v10, %v437_v16 }
  0xb2   : > { %v406_v11 = vpop.permute.xlu1 %405  ;;  %v401_v12 = vpop.permute.xlu0 %400 }
  0xb3   : > { %v438_v17 = vsel %vm326_vm13, %v401_v12, 0.0  ;;  %v439_v29 = vsel %vm327_vm0, %v406_v11, 0.0 }
  0xb4   : > { %v466_v22 = vadd.f32 %v465_v18, %v438_v17 }
  0xb6   : > { %v467_v31 = vadd.f32 %v466_v22, %v439_v29 }
  0xb8   : > { %v468_v40 = vadd.f32 %v467_v31, %v440_v38 }
  0xba   : > { %v416_v26 = vpop.permute.xlu1 %415  ;;  %v295_v27 = vpop.permute.xlu0 %294 }
  0xbb   : > { %v312_v30 = vsel %vm256_vm1, %v295_v27, 0.0  ;;  %v441_v39 = vsel %vm329_vm3, %v416_v26, 0.0 }
  0xbc   : > { %v448_v37 = vadd.f32 %v447_v32, %v312_v30  ;;  %v469_v42 = vadd.f32 %v468_v40, %v441_v39 }
  0xbe   : > { %v449_v44 = vadd.f32 %v448_v37, %v313_v25 }
  0xc2   : > { %v305_v43 = vpop.permute.xlu1 %304  ;;  %v421_v45 = vpop.permute.xlu0 %420 }
  0xc3   : > { %v314_v46 = vsel %vm258_vm5, %v305_v43, 0.0  ;;  %v442_v47 = vsel %vm330_vm6, %v421_v45, 0.0 }
  0xc4   : > { %v450_v33 = vadd.f32 %v449_v44, %v314_v46  ;;  %v470_v48 = vadd.f32 %v469_v42, %v442_v47 }
  0xc6   : > { %v451_v50 = vrot.slane %v450_v33, 4  ;;  %v471_v51 = vadd.f32 %v470_v48, %v443_v49 }
  0xc8   : > { %v452_v52 = vadd.f32 %v451_v50, %v450_v33  ;;  %v472_v53 = vrot.slane %v471_v51, 4 }
  0xca   : > { %v453_v54 = vrot.slane %v452_v52, 2  ;;  %v473_v55 = vadd.f32 %v472_v53, %v471_v51 }
  0xcc   : > { %v454_v56 = vadd.f32 %v453_v54, %v452_v52  ;;  %v474_v57 = vrot.slane %v473_v55, 2 }
  0xce   : > { %v455_v34 = vrot.slane %v454_v56, 1  ;;  %v475_v58 = vadd.f32 %v474_v57, %v473_v55 }
  0xd0   : > { %v476_v59 = vrot.slane %v475_v58, 1  ;;  %v456_v60 = vadd.f32 %v455_v34, %v454_v56 }
  0xd2   : > { %v477_v61 = vadd.f32 %v476_v59, %v475_v58 }
  0xd4   : > { %v478_v63 = vadd.f32 %v477_v61, %v456_v60 }
  0xd6   : > { %v481_v0 = vadd.f32 %v480_v62, %v478_v63 }
  0xd8   : > { %v580_v1 = vmul.f32 -1.442695, %v481_v0 }
  0xda   : > { %628 = vpow2.f32 %v580_v1 }
  0xe0   : > { %v629_v2 = vpop.eup %628 }
  0xe1   : > { %v485_v3 = vadd.f32 1.0, %v629_v2 }
  0xe3   : > { %630 = vrcp.f32 %v485_v3  ;;  %v497_v7 = vand.u32 2147483648, %v485_v3  ;;  %v495_v9 = vand.u32 2147483647, %v485_v3  ;;  %vm491_vm9 = vweird.f32 %v485_v3 }
  0xe5   : > { %v498_v11 = vor.u32 1.1754944e-38, %v497_v7  ;;  %vm496_vm11 = vcmp.eq.f32.partialorder %v495_v9, 8.507059e+37 }
  0xe9   : > { %v631_v4 = vpop.eup %630 }
  0xea   : > { %v487_v5 = vmul.f32 %v631_v4, %v485_v3  ;;  %vm492_vm8 = vweird.f32 %v631_v4 }
  0xeb   : > { %vm493_vm10 = vmor %vm491_vm9, %vm492_vm8 }
  0xec   : > { %v488_v6 = vsub.f32 1.0, %v487_v5 }
  0xee   : > { %v489_v8 = vmul.f32 %v631_v4, %v488_v6 }
  0xf0   : > { %v490_v10 = vadd.f32 %v631_v4, %v489_v8 }
  0xf2   : > { %v494_v12 = vsel %vm493_vm10, %v631_v4, %v490_v10 }
  0xf3   : > { %v499_v13 = vsel %vm496_vm11, %v498_v11, %v494_v12 }
  0xf4   : > { %501 = vst [vmem:[%s224_s8] sm:$0x1] %v499_v13 }
  0xf5   : > { %659 = shalt.err (!%p656_p3)
}
  0xf6   : > { %583 = dma.vmem_to_hbm [thread:$0]  (%p768_p5), %s514_s9, 16, %s516_s10, %s503_s11  }
  0xf7 PF: > { %p589_p4 = scmp.ge.s32.totalorder %s694_s23, 2  ;;  %s527_s18 = sand.u32 1, %s682_s20  }
  0xf8   : > { %s528_s26 = scalar_lea.sflag [#allocation4], %s527_s18 }
  0xf9   : > { %p586_p7 = pnand %p589_p4, %p772_p6 }
  0xfb   : > { %p587_p8 = pneg %p586_p7 }
  0xfd   : > { %677 = dma.done.wait (%p587_p8), %s528_s26, 16  }
  0xfe   : > { %679 = vsyncadd (%p587_p8), %s528_s26, 4294967280  ;;  %p16_p9 = scmp.ge.s32.totalorder %s755_s25, 4   ;;  %s976_s20 = smov %s686_s21 }
  0xff   : > { %s977_s21 = smov %s690_s22  ;;  %s978_s22 = smov %s766_s28 }
 0x100   : > { %s979_s23 = smov %s755_s25  ;;  %18 = sbr.rel (!%p16_p9) target bundleno = 5 (0x5), region = 78 }
 0x105   :  { %533 = vsyncpa [#allocation4], 1 }
 0x106   :  { %535 = vsyncpa [#allocation4 + $0x1], 1 }

</bundles_post_ra>
